<compile_context>
chip_gen: v6e
topology: v6e:2x2x1
jax: 0.10.0
libtpu: 0.0.40
codegen_flags: <defaults>
</compile_context>

<pallas_src>
import functools

import jax
import jax.numpy as jnp
from jax.experimental import pallas as pl
from jax.experimental.pallas import tpu as pltpu


def _round_up(x, m):
    return (x + m - 1) // m * m


def _vmem_limit_bytes():
    """Per-generation scoped-VMEM budget with headroom for Mosaic scratch/spill.

    v5e/v6e (128 MiB physical) -> ~100 MiB; v7x (64 MiB per TensorCore) -> ~48 MiB.
    """
    try:
        cap = pltpu.get_tpu_info().vmem_capacity_bytes
        return int(min(cap - 16 * 1024 * 1024, 100 * 1024 * 1024))
    except Exception:
        return 48 * 1024 * 1024  # conservative: always fits a v7x TensorCore


def covernet_head_kernel(*refs, n_layers, apply_softmax):
    """Fused affine head (+ optional softmax), entirely in VMEM.

    refs = (x_ref, w_1..w_n, b_1..b_n, out_ref)
      x_ref : (TB, K0)          f32   (unpadded feature dim; cast to bf16 in-kernel)
      w_i   : (Ki_pad, Ni_pad)  bf16  (already transposed to (in, out))
      b_i   : (1,  Ni_pad)      f32   (final layer's padded lanes pre-set to -1e30)
      out   : (TB, Nn_pad)      f32
    """
    x_ref = refs[0]
    w_refs = refs[1:1 + n_layers]
    b_refs = refs[1 + n_layers:1 + 2 * n_layers]
    out_ref = refs[1 + 2 * n_layers]

    h = x_ref[...].astype(jnp.bfloat16)                       # VPU cast, feeds MXU
    for li in range(n_layers):
        acc = jnp.dot(h, w_refs[li][...],
                      preferred_element_type=jnp.float32)     # MXU, f32 accumulate
        acc = acc + b_refs[li][...]                           # f32 bias add (masks pad lanes)
        h = acc.astype(jnp.bfloat16) if li + 1 < n_layers else acc

    if apply_softmax:
        # Padded mode lanes carry -1e30 from the bias, so exp() -> 0: no mask needed.
        m = jnp.max(h, axis=-1, keepdims=True)
        e = jnp.exp(h - m)
        s = jnp.sum(e, axis=-1, keepdims=True)
        r = pl.reciprocal(s, approx=True)                     # EUP slot
        r = r * (2.0 - s * r)                                 # one Newton step -> exact-ish
        h = e * r

    out_ref[...] = h.astype(out_ref.dtype)


def prepare_covernet_params(pt_weights, pt_biases, collapse=True):
    """One-time parameter prep (do NOT call per forward).

    Takes nn.Linear-layout params (W: (out, in), b: (out,)).  Because the head has
    no nonlinearity, the whole chain is a single affine map: when it does not grow
    the parameter count, the layers are composed in f32 into one (in, num_modes)
    weight + bias.  Results are returned transposed to (in, out), lane-padded,
    cast to bf16 (weights) / f32 (biases); the final bias' padded lanes are -1e30
    so the softmax ignores them without an in-kernel mask.
    """
    mats = [jnp.asarray(w, jnp.float32).T for w in pt_weights]   # (in, out)
    vecs = [jnp.asarray(b, jnp.float32) for b in pt_biases]

    if collapse and len(mats) > 1:
        w_eff, b_eff = mats[0], vecs[0]
        for w, b in zip(mats[1:], vecs[1:]):
            w_eff = w_eff @ w
            b_eff = b_eff @ w + b
        # Only keep the collapsed form when it is not larger (no bottleneck layer).
        if w_eff.size <= sum(m.size for m in mats):
            mats, vecs = [w_eff], [b_eff]

    ws, bs = [], []
    prev_n_pad = mats[0].shape[0]          # x is passed with its true feature dim
    n_layers = len(mats)
    for li, (w, b) in enumerate(zip(mats, vecs)):
        in_dim, out_dim = w.shape
        k_pad = prev_n_pad                 # must match previous layer's padded output
        # 256-lane alignment feeds the v6e/v7x 2x256^2 MXU; 128 for small dims / v5e.
        lane = 256 if out_dim > 128 else 128
        n_pad = _round_up(out_dim, lane)

        w_p = jnp.zeros((k_pad, n_pad), jnp.bfloat16)
        w_p = w_p.at[:in_dim, :out_dim].set(w.astype(jnp.bfloat16))

        pad_fill = -1e30 if li == n_layers - 1 else 0.0   # mask pad modes via bias add
        b_p = jnp.full((1, n_pad), pad_fill, jnp.float32)
        b_p = b_p.at[:, :out_dim].set(b.reshape(1, -1))

        ws.append(w_p)
        bs.append(b_p)
        prev_n_pad = n_pad
    return ws, bs


def _run_head(x, ws, bs, kernel, tb, b_pad, n_pad, single_buffer_weights):
    in_dim = x.shape[1]
    wb_kwargs = {}
    if single_buffer_weights:
        # Grid-invariant blocks: fetched once; double buffering only doubles VMEM.
        wb_kwargs = dict(pipeline_mode=pl.Buffered(buffer_count=1))

    in_specs = [pl.BlockSpec((tb, in_dim), lambda i: (i, 0))]
    in_specs += [pl.BlockSpec(w.shape, lambda i: (0, 0), **wb_kwargs) for w in ws]
    in_specs += [pl.BlockSpec(b.shape, lambda i: (0, 0), **wb_kwargs) for b in bs]

    return pl.pallas_call(
        kernel,
        out_shape=jax.ShapeDtypeStruct((b_pad, n_pad), jnp.float32),
        grid=(b_pad // tb,),
        in_specs=in_specs,
        out_specs=pl.BlockSpec((tb, n_pad), lambda i: (i, 0)),
        compiler_params=pltpu.CompilerParams(
            dimension_semantics=("parallel",),
            vmem_limit_bytes=_vmem_limit_bytes(),
        ),
    )(x, *ws, *bs)


def covernet_forward(reg_features, ws, bs, num_modes, training=False):
    """CoverNet.forward equivalent on pre-prepared (padded, bf16) params.

    Returns (B, num_modes) f32 = batch_dict['logits'] (softmaxed unless training).
    """
    n_layers = len(ws)
    B, in_dim = reg_features.shape
    assert ws[0].shape[0] == in_dim, "params were prepared for a different input_dim"
    n_pad = ws[-1].shape[1]

    # Batch tile: up to 256 rows (amortizes ~0.35us/grid-step, fills the 256-wide
    # MXU on v6e/v7x); multiple of 16 sublanes for bf16 packing of the activations.
    tb = min(256, _round_up(B, 16))
    b_pad = _round_up(B, tb)

    # Only batch-pad (fusable jnp.pad); K stays the true feature dim and the bf16
    # cast happens inside the kernel -> no extra padded HBM copy of the activations.
    x = reg_features.astype(jnp.float32)
    if b_pad != B:
        x = jnp.pad(x, ((0, b_pad - B), (0, 0)))

    kernel = functools.partial(
        covernet_head_kernel, n_layers=n_layers, apply_softmax=not training)

    # TODO(synk): for heads whose collapsed weight (input_dim x num_modes bf16) does
    # not fit the VMEM budget, add a second grid axis tiling the mode dimension of
    # the final weight/output with a two-pass (max/sum in scratch) softmax.
    try:
        out = _run_head(x, ws, bs, kernel, tb, b_pad, n_pad,
                        single_buffer_weights=True)
    except Exception:
        # Fallback for jax/Mosaic versions without BlockSpec pipeline_mode support.
        out = _run_head(x, ws, bs, kernel, tb, b_pad, n_pad,
                        single_buffer_weights=False)

    if b_pad != B or n_pad != num_modes:
        out = out[:B, :num_modes]
    return out


def _make_params(key, dims):
    """Deterministic nn.Linear-like init: W, b ~ U(-k, k), k = 1/sqrt(fan_in)."""
    weights, biases = [], []
    for d_in, d_out in zip(dims[:-1], dims[1:]):
        key, kw, kb = jax.random.split(key, 3)
        bound = 1.0 / jnp.sqrt(jnp.float32(d_in))
        w = jax.random.uniform(kw, (d_out, d_in), jnp.float32, -bound, bound)
        b = jax.random.uniform(kb, (d_out,), jnp.float32, -bound, bound)
        weights.append(w)
        biases.append(b)
    return weights, biases


if __name__ == "__main__":
    # Small cfg consistent with the module: input_dim=32, n_hidden_layers=[64], num_modes=16.
    batch = 2
    input_dim = 32
    hidden = [64]
    num_modes = 16
    dims = [input_dim] + hidden + [num_modes]

    key = jax.random.PRNGKey(0)
    key, kx = jax.random.split(key)
    reg_features = jax.random.normal(kx, (batch, input_dim), jnp.float32)
    weights, biases = _make_params(key, dims)

    # One-time parameter preparation (collapse + transpose + pad + bf16 cast).
    ws, bs = prepare_covernet_params(weights, biases)

    # Eval-mode forward (softmax applied).  TODO(synk): training-mode
    # CrossEntropyLoss (get_loss) is not part of forward; left to plain JAX.
    probs = covernet_forward(reg_features, ws, bs, num_modes, training=False)
    probs = jax.block_until_ready(probs)

    # Exact f32 reference of the module's eval forward.
    h = reg_features
    for w, b in zip(weights, biases):
        h = h @ w.T + b
    ref = jax.nn.softmax(h, axis=-1)

    assert probs.shape == (batch, num_modes)
    assert jnp.allclose(probs, ref, atol=3e-3, rtol=1e-2), "mismatch vs reference"
    assert jnp.allclose(jnp.sum(probs, axis=-1), 1.0, atol=1e-3), "softmax not normalized"

    print("KERNEL_OK")
</pallas_src>

<mosaic_0001>
module attributes {stable_mosaic.version = 11 : i64} {
  func.func @covernet_head_kernel(%arg0: i32, %arg1: memref<16x32xf32, #tpu.memory_space<vmem>>, %arg2: memref<32x128xbf16, #tpu.memory_space<vmem>>, %arg3: memref<1x128xf32, #tpu.memory_space<vmem>>, %arg4: memref<16x128xf32, #tpu.memory_space<vmem>>) attributes {dimension_semantics = [#tpu.dimension_semantics<parallel>], iteration_bounds = array<i64: 1>, scalar_prefetch = 0 : i64, scratch_operands = 0 : i64, tpu.core_type = #tpu.core_type<tc>, window_params = [{transform_indices = @transform_0, window_bounds = array<i64: 16, 32>}, {pipeline_mode = #tpu.pipeline_mode<synchronous>, transform_indices = @transform_1, window_bounds = array<i64: 32, 128>}, {pipeline_mode = #tpu.pipeline_mode<synchronous>, transform_indices = @transform_2, window_bounds = array<i64: 1, 128>}, {transform_indices = @transform_3, window_bounds = array<i64: 16, 128>}]} {
    %c0 = arith.constant 0 : index
    %c0_0 = arith.constant 0 : index
    %0 = vector.load %arg1[%c0, %c0_0] : memref<16x32xf32, #tpu.memory_space<vmem>>, vector<16x32xf32>
    %1 = arith.truncf %0 : vector<16x32xf32> to vector<16x32xbf16>
    %c0_1 = arith.constant 0 : index
    %c0_2 = arith.constant 0 : index
    %2 = vector.load %arg2[%c0_1, %c0_2] : memref<32x128xbf16, #tpu.memory_space<vmem>>, vector<32x128xbf16>
    %cst = arith.constant dense<0.000000e+00> : vector<16x128xf32>
    %3 = tpu.matmul %1, %2, %cst {dimension_numbers = #tpu.dot_dimension_numbers<[1], [0], [0], [1], [0, 0, 1, 1], [], []>} : vector<16x32xbf16>, vector<32x128xbf16>, vector<16x128xf32> -> vector<16x128xf32>
    %c0_3 = arith.constant 0 : index
    %c0_4 = arith.constant 0 : index
    %4 = vector.load %arg3[%c0_3, %c0_4] : memref<1x128xf32, #tpu.memory_space<vmem>>, vector<1x128xf32>
    %5 = vector.broadcast %4 : vector<1x128xf32> to vector<16x128xf32>
    %6 = arith.addf %3, %5 : vector<16x128xf32>
    %cst_5 = arith.constant dense<0xFF800000> : vector<16xf32>
    %7 = vector.multi_reduction <maximumf>, %6, %cst_5 [1] : vector<16x128xf32> to vector<16xf32>
    %8 = vector.shape_cast %7 : vector<16xf32> to vector<16x1xf32>
    %9 = vector.broadcast %8 : vector<16x1xf32> to vector<16x128xf32>
    %10 = arith.subf %6, %9 : vector<16x128xf32>
    %11 = math.exp %10 : vector<16x128xf32>
    %cst_6 = arith.constant dense<0.000000e+00> : vector<16xf32>
    %12 = vector.multi_reduction <add>, %11, %cst_6 [1] : vector<16x128xf32> to vector<16xf32>
    %13 = vector.shape_cast %12 : vector<16xf32> to vector<16x1xf32>
    %14 = tpu.reciprocal %13 {approx = true} : vector<16x1xf32> -> vector<16x1xf32>
    %15 = arith.mulf %13, %14 : vector<16x1xf32>
    %cst_7 = arith.constant 2.000000e+00 : f32
    %16 = vector.broadcast %cst_7 : f32 to vector<16x1xf32>
    %17 = arith.subf %16, %15 : vector<16x1xf32>
    %18 = arith.mulf %14, %17 : vector<16x1xf32>
    %19 = vector.broadcast %18 : vector<16x1xf32> to vector<16x128xf32>
    %20 = arith.mulf %11, %19 : vector<16x128xf32>
    %c0_8 = arith.constant 0 : index
    %c0_9 = arith.constant 0 : index
    %21 = vector.load %arg4[%c0_8, %c0_9] : memref<16x128xf32, #tpu.memory_space<vmem>>, vector<16x128xf32>
    tpu.vector_store %arg4[%c0_8, %c0_9], %20 {strides = array<i32>} : memref<16x128xf32, #tpu.memory_space<vmem>>, vector<16x128xf32>,
    return
  }
  func.func @transform_0(%arg0: i32) -> (i32, i32) {
    %c0_i32 = arith.constant 0 : i32
    %c0_i32_0 = arith.constant 0 : i32
    return %arg0, %c0_i32 : i32, i32
  }
  func.func @transform_1(%arg0: i32) -> (i32, i32) {
    %c0_i32 = arith.constant 0 : i32
    %c0_i32_0 = arith.constant 0 : i32
    %c0_i32_1 = arith.constant 0 : i32
    return %c0_i32, %c0_i32_0 : i32, i32
  }
  func.func @transform_2(%arg0: i32) -> (i32, i32) {
    %c0_i32 = arith.constant 0 : i32
    %c0_i32_0 = arith.constant 0 : i32
    %c0_i32_1 = arith.constant 0 : i32
    return %c0_i32, %c0_i32_0 : i32, i32
  }
  func.func @transform_3(%arg0: i32) -> (i32, i32) {
    %c0_i32 = arith.constant 0 : i32
    %c0_i32_0 = arith.constant 0 : i32
    return %arg0, %c0_i32 : i32, i32
  }
}

module attributes {stable_mosaic.version = 11 : i64} {
  func.func @covernet_head_kernel(%arg0: i32, %arg1: memref<16x32xf32, #tpu.memory_space<vmem>>, %arg2: memref<32x128xbf16, #tpu.memory_space<vmem>>, %arg3: memref<1x128xf32, #tpu.memory_space<vmem>>, %arg4: memref<16x128xf32, #tpu.memory_space<vmem>>) attributes {dimension_semantics = [#tpu.dimension_semantics<parallel>], iteration_bounds = array<i64: 1>, scalar_prefetch = 0 : i64, scratch_operands = 0 : i64, tpu.core_type = #tpu.core_type<tc>, window_params = [{transform_indices = @transform_0, window_bounds = array<i64: 16, 32>}, {pipeline_mode = #tpu.pipeline_mode<synchronous>, transform_indices = @transform_1, window_bounds = array<i64: 32, 128>}, {pipeline_mode = #tpu.pipeline_mode<synchronous>, transform_indices = @transform_2, window_bounds = array<i64: 1, 128>}, {transform_indices = @transform_3, window_bounds = array<i64: 16, 128>}]} {
    %c0 = arith.constant 0 : index
    %c0_0 = arith.constant 0 : index
    %0 = vector.load %arg1[%c0, %c0_0] : memref<16x32xf32, #tpu.memory_space<vmem>>, vector<16x32xf32>
    %1 = arith.truncf %0 : vector<16x32xf32> to vector<16x32xbf16>
    %c0_1 = arith.constant 0 : index
    %c0_2 = arith.constant 0 : index
    %2 = vector.load %arg2[%c0_1, %c0_2] : memref<32x128xbf16, #tpu.memory_space<vmem>>, vector<32x128xbf16>
    %cst = arith.constant dense<0.000000e+00> : vector<16x128xf32>
    %3 = tpu.matmul %1, %2, %cst {dimension_numbers = #tpu.dot_dimension_numbers<[1], [0], [0], [1], [0, 0, 1, 1], [], []>} : vector<16x32xbf16>, vector<32x128xbf16>, vector<16x128xf32> -> vector<16x128xf32>
    %c0_3 = arith.constant 0 : index
    %c0_4 = arith.constant 0 : index
    %4 = vector.load %arg3[%c0_3, %c0_4] : memref<1x128xf32, #tpu.memory_space<vmem>>, vector<1x128xf32>
    %5 = vector.broadcast %4 : vector<1x128xf32> to vector<16x128xf32>
    %6 = arith.addf %3, %5 : vector<16x128xf32>
    %cst_5 = arith.constant dense<0xFF800000> : vector<16xf32>
    %7 = vector.multi_reduction <maximumf>, %6, %cst_5 [1] : vector<16x128xf32> to vector<16xf32>
    %8 = vector.shape_cast %7 : vector<16xf32> to vector<16x1xf32>
    %9 = vector.broadcast %8 : vector<16x1xf32> to vector<16x128xf32>
    %10 = arith.subf %6, %9 : vector<16x128xf32>
    %11 = math.exp %10 : vector<16x128xf32>
    %cst_6 = arith.constant dense<0.000000e+00> : vector<16xf32>
    %12 = vector.multi_reduction <add>, %11, %cst_6 [1] : vector<16x128xf32> to vector<16xf32>
    %13 = vector.shape_cast %12 : vector<16xf32> to vector<16x1xf32>
    %14 = tpu.reciprocal %13 {approx = true} : vector<16x1xf32> -> vector<16x1xf32>
    %15 = arith.mulf %13, %14 : vector<16x1xf32>
    %cst_7 = arith.constant 2.000000e+00 : f32
    %16 = vector.broadcast %cst_7 : f32 to vector<16x1xf32>
    %17 = arith.subf %16, %15 : vector<16x1xf32>
    %18 = arith.mulf %14, %17 : vector<16x1xf32>
    %19 = vector.broadcast %18 : vector<16x1xf32> to vector<16x128xf32>
    %20 = arith.mulf %11, %19 : vector<16x128xf32>
    %c0_8 = arith.constant 0 : index
    %c0_9 = arith.constant 0 : index
    %21 = vector.load %arg4[%c0_8, %c0_9] : memref<16x128xf32, #tpu.memory_space<vmem>>, vector<16x128xf32>
    tpu.vector_store %arg4[%c0_8, %c0_9], %20 {strides = array<i32>} : memref<16x128xf32, #tpu.memory_space<vmem>>, vector<16x128xf32>,
    return
  }
  func.func @transform_0(%arg0: i32) -> (i32, i32) {
    %c0_i32 = arith.constant 0 : i32
    %c0_i32_0 = arith.constant 0 : i32
    return %arg0, %c0_i32 : i32, i32
  }
  func.func @transform_1(%arg0: i32) -> (i32, i32) {
    %c0_i32 = arith.constant 0 : i32
    %c0_i32_0 = arith.constant 0 : i32
    %c0_i32_1 = arith.constant 0 : i32
    return %c0_i32, %c0_i32_0 : i32, i32
  }
  func.func @transform_2(%arg0: i32) -> (i32, i32) {
    %c0_i32 = arith.constant 0 : i32
    %c0_i32_0 = arith.constant 0 : i32
    %c0_i32_1 = arith.constant 0 : i32
    return %c0_i32, %c0_i32_0 : i32, i32
  }
  func.func @transform_3(%arg0: i32) -> (i32, i32) {
    %c0_i32 = arith.constant 0 : i32
    %c0_i32_0 = arith.constant 0 : i32
    return %arg0, %c0_i32 : i32, i32
  }
}

</mosaic_0001>

<bundles_post_ra>
// kernel: tpu_custom_call.1
= control target key start
LH: loop header
LB: loop body
LE: loop exit
PB: predicated region body
PF: predicated region fallthrough
CT: control target
= control target key end

     0   :  { %8 = vsyncpa [#allocation3], 0  ;;  %s306_s0 = inlined_call_operand.hbm [shape: f32[16,32], index: 0, kind: input, shape index: {}]   ;;  %s307_s1 = inlined_call_operand.hbm [shape: bf16[32,128], index: 1, kind: input, shape index: {}]   ;;  %s308_s2 = inlined_call_operand.vmem [shape: f32[1,128], index: 2, kind: input, shape index: {}]   ;;  %s309_s3 = inlined_call_operand.hbm [shape: f32[16,128], index: 3, kind: output, shape index: {}]  }
   0x1   :  { %9 = vsyncpa [#allocation6], 0 }
   0x2   :  { %10 = vsyncpa [#allocation4], 0  ;;  %s259_s12 = smov [#allocation2]  }
   0x3   :  { %s16_s13 = sshll.u32 %s259_s12, 4  ;;  %s17_s13 = int_to_ptr.vmem [resolvable:$true] %s16_s13 }
   0x4   :  { %s201_s14 = scalar_lea.vmem %s17_s13, 256  ;;  %p206_p1 = scmp.lt.s32.totalorder %s17_s13, %s17_s13 }
   0x5   :  { %p202_p0 = scmp.ne.s32.totalorder %s17_s13, %s201_s14  ;;  %p207_p2 = scmp.lt.s32.totalorder %s201_s14, %s201_s14 }
   0x7   :  { %p208_p3 = por %p207_p2, %p206_p1 }
   0x9   :  { %p209_p4 = pnand %p208_p3, %p202_p0 }
   0xb   :  { %212 = shalt.err (!%p209_p4)
}
   0xc   :  { %s260_s15 = smov 128   ;;  %s261_s16 = smov 8  }
   0xd   :  { %22 = dma.hbm_to_vmem [thread:$0]  %s306_s0, 256, %s17_s13, [#allocation3], %s260_s15, %s260_s15, %s261_s16  }
   0xe   :  { %s262_s19 = smov [#allocation5]  }
   0xf   :  { %s28_s20 = sshll.u32 %s262_s19, 4  ;;  %s29_s20 = int_to_ptr.vmem [resolvable:$true] %s28_s20 }
  0x10   :  { %s221_s21 = scalar_lea.vmem %s29_s20, 256  ;;  %p226_p6 = scmp.lt.s32.totalorder %s29_s20, %s29_s20 }
  0x11   :  { %p222_p5 = scmp.ne.s32.totalorder %s29_s20, %s221_s21  ;;  %p227_p7 = scmp.lt.s32.totalorder %s221_s21, %s221_s21 }
  0x13   :  { %p228_p8 = por %p227_p7, %p226_p6 }
  0x15   :  { %p229_p9 = pnand %p228_p8, %p222_p5 }
  0x17   :  { %232 = shalt.err (!%p229_p9)
}
  0x18   :  { %s263_s22 = smov 64   ;;  %s264_s23 = smov 4  }
  0x19   :  { %34 = dma.hbm_to_vmem [thread:$0]  %s307_s1, 256, %s29_s20, [#allocation6], %s263_s22, %s263_s22, %s264_s23  }
  0x1a   :  { %253 = dma.done.wait [#allocation3], 256  }
  0x1b   :  { %254 = vsyncadd [#allocation3], 4294967040 }
  0x1c   :  { %255 = dma.done.wait [#allocation6], 256  }
  0x1d   :  { %256 = vsyncadd [#allocation6], 4294967040  ;;  %v265_v0 = vmov 0.0   ;;  %vm266_vm0 = vmmov 0   ;;  %v183_v1 = vld [vmem:[#allocation5 + $0x8] sm:$0xff]   ;;  %v184_v2 = vld [vmem:[#allocation5] sm:$0xff]  }
  0x1e   :  { %166 = vmatprep.subr.bf16.mxu0 %v265_v0  ;;  %170 = vmatprep.mubr.msk.bf16.mxu0 %vm266_vm0, %v265_v0  ;;  %v44_v3 = vld [vmem:[#allocation2] sm:$0xff]  ;;  %v45_v4 = vld [vmem:[#allocation2 + $0x8] sm:$0xff]  ;;  %vm70_vm1 = vcmask 261120  }
  0x1f   :  { %167 = vmatpush3.bf16.msra.mxu0 %v183_v1  ;;  %v46_v5 = vpack.c.bf16 %v45_v4, %v44_v3  ;;  %v159_v6 = vld [vmem:[%s308_s2] ss:$0 sm:$0xff]  ;;  %s267_s2 = smov [#allocation7]  }
  0x20   :  { %168 = vmatprep.subr.bf16.mxu0 %v265_v0  ;;  %s146_s26 = sshll.u32 %s267_s2, 4  ;;  %s147_s26 = int_to_ptr.vmem [resolvable:$true] %s146_s26 }
  0x21   :  { %s233_s27 = scalar_lea.vmem %s147_s26, 256  ;;  %p238_p11 = scmp.lt.s32.totalorder %s147_s26, %s147_s26 }
  0x22   :  { %p234_p10 = scmp.ne.s32.totalorder %s147_s26, %s233_s27  ;;  %p239_p12 = scmp.lt.s32.totalorder %s233_s27, %s233_s27 }
  0x23   :  { %169 = vmatpush3.bf16.msra.mxu0 %v184_v2 }
  0x24   :  { %p240_p13 = por %p239_p12, %p238_p11 }
  0x26   :  { %171 = vmatmul.mubr.msk.bf16.vlgmr.msra.gmra.mxu0 %vm70_vm1, %v46_v5  ;;  %p241_p0 = pnand %p240_p13, %p234_p10 }
  0xe6   :  { %v108_v7 = vpop.f32.mrf.mxu0 }
  0xe7   :  { %v109_v8 = vadd.f32 %v159_v6, %v108_v7 }
  0xe8   :  { %v172_v9 = vpop.f32.mrf.mxu0 }
  0xe9   :  { %115 = vmax.xlane.f32.xlu0 %v109_v8 }
  0xea   :  { %v111_v10 = vpop.f32.mrf.mxu0 }
  0xeb   :  { %v112_v11 = vadd.f32 %v159_v6, %v111_v10 }
  0xec   :  { %v173_v12 = vpop.f32.mrf.mxu0 }
  0xed   :  { %117 = vmax.xlane.f32.xlu0 %v112_v11 }
 0x172   :  { %v116_v13 = vpop.xlane.xlu0 %115 }
 0x173   :  { %v119_v14 = vsub.f32 %v109_v8, %v116_v13 }
 0x175   :  { %v121_v15 = vmul.f32 1.442695, %v119_v14 }
 0x176   :  { %v118_v16 = vpop.xlane.xlu0 %117 }
 0x177   :  { %185 = vpow2.f32 %v121_v15  ;;  %v120_v17 = vsub.f32 %v112_v11, %v118_v16 }
 0x179   :  { %v123_v18 = vmul.f32 1.442695, %v120_v17 }
 0x17b   :  { %187 = vpow2.f32 %v123_v18 }
 0x184   :  { %v186_v19 = vpop.eup %185 }
 0x185   :  { %125 = vadd.xlane.f32.xlu1 %v186_v19 }
 0x188   :  { %v188_v20 = vpop.eup %187 }
 0x189   :  { %127 = vadd.xlane.f32.xlu1 %v188_v20 }
 0x20e   :  { %v126_v21 = vpop.xlane.xlu1 %125 }
 0x20f   :  { %189 = vrcp.f32 %v126_v21 }
 0x212   :  { %v128_v22 = vpop.xlane.xlu1 %127 }
 0x213   :  { %191 = vrcp.f32 %v128_v22 }
 0x21c   :  { %v190_v23 = vpop.eup %189 }
 0x21d   :  { %v131_v24 = vmul.f32 %v190_v23, %v126_v21 }
 0x21f   :  { %v133_v25 = vsub.f32 2.0, %v131_v24 }
 0x220   :  { %v192_v26 = vpop.eup %191 }
 0x221   :  { %v135_v27 = vmul.f32 %v190_v23, %v133_v25  ;;  %v132_v28 = vmul.f32 %v192_v26, %v128_v22 }
 0x223   :  { %v134_v29 = vsub.f32 2.0, %v132_v28  ;;  %v137_v30 = vmul.f32 %v186_v19, %v135_v27 }
 0x225   :  { %v136_v31 = vmul.f32 %v192_v26, %v134_v29  ;;  %139 = vst [vmem:[#allocation7] sm:$0xff] %v137_v30 }
 0x227   :  { %v138_v32 = vmul.f32 %v188_v20, %v136_v31 }
 0x229   :  { %140 = vst [vmem:[#allocation7 + $0x8] sm:$0xff] %v138_v32 }
 0x22a   :  { %244 = shalt.err (!%p241_p0)
}
 0x22b   :  { %152 = dma.vmem_to_hbm [thread:$0]  %s147_s26, 256, %s309_s3, [#allocation4], %s260_s15, %s260_s15, %s261_s16  }
 0x22c   :  { %257 = dma.done.wait [#allocation4], 256  }
 0x22d   :  { %258 = vsyncadd [#allocation4], 4294967040 }
 0x22e   :  { %156 = vsyncpa [#allocation3], 1 }
 0x22f   :  { %157 = vsyncpa [#allocation6], 1 }
 0x230   :  { %158 = vsyncpa [#allocation4], 1 }

// kernel: tpu_custom_call.1
= control target key start
LH: loop header
LB: loop body
LE: loop exit
PB: predicated region body
PF: predicated region fallthrough
CT: control target
= control target key end

     0   :  { %8 = vsyncpa [#allocation3], 0  ;;  %s306_s0 = inlined_call_operand.hbm [shape: f32[16,32], index: 0, kind: input, shape index: {}]   ;;  %s307_s1 = inlined_call_operand.hbm [shape: bf16[32,128], index: 1, kind: input, shape index: {}]   ;;  %s308_s2 = inlined_call_operand.vmem [shape: f32[1,128], index: 2, kind: input, shape index: {}]   ;;  %s309_s3 = inlined_call_operand.hbm [shape: f32[16,128], index: 3, kind: output, shape index: {}]  }
   0x1   :  { %9 = vsyncpa [#allocation6], 0 }
   0x2   :  { %10 = vsyncpa [#allocation4], 0  ;;  %s259_s12 = smov [#allocation2]  }
   0x3   :  { %s16_s13 = sshll.u32 %s259_s12, 4  ;;  %s17_s13 = int_to_ptr.vmem [resolvable:$true] %s16_s13 }
   0x4   :  { %s201_s14 = scalar_lea.vmem %s17_s13, 256  ;;  %p206_p1 = scmp.lt.s32.totalorder %s17_s13, %s17_s13 }
   0x5   :  { %p202_p0 = scmp.ne.s32.totalorder %s17_s13, %s201_s14  ;;  %p207_p2 = scmp.lt.s32.totalorder %s201_s14, %s201_s14 }
   0x7   :  { %p208_p3 = por %p207_p2, %p206_p1 }
   0x9   :  { %p209_p4 = pnand %p208_p3, %p202_p0 }
   0xb   :  { %212 = shalt.err (!%p209_p4)
}
   0xc   :  { %s260_s15 = smov 128   ;;  %s261_s16 = smov 8  }
   0xd   :  { %22 = dma.hbm_to_vmem [thread:$0]  %s306_s0, 256, %s17_s13, [#allocation3], %s260_s15, %s260_s15, %s261_s16  }
   0xe   :  { %s262_s19 = smov [#allocation5]  }
   0xf   :  { %s28_s20 = sshll.u32 %s262_s19, 4  ;;  %s29_s20 = int_to_ptr.vmem [resolvable:$true] %s28_s20 }
  0x10   :  { %s221_s21 = scalar_lea.vmem %s29_s20, 256  ;;  %p226_p6 = scmp.lt.s32.totalorder %s29_s20, %s29_s20 }
  0x11   :  { %p222_p5 = scmp.ne.s32.totalorder %s29_s20, %s221_s21  ;;  %p227_p7 = scmp.lt.s32.totalorder %s221_s21, %s221_s21 }
  0x13   :  { %p228_p8 = por %p227_p7, %p226_p6 }
  0x15   :  { %p229_p9 = pnand %p228_p8, %p222_p5 }
  0x17   :  { %232 = shalt.err (!%p229_p9)
}
  0x18   :  { %s263_s22 = smov 64   ;;  %s264_s23 = smov 4  }
  0x19   :  { %34 = dma.hbm_to_vmem [thread:$0]  %s307_s1, 256, %s29_s20, [#allocation6], %s263_s22, %s263_s22, %s264_s23  }
  0x1a   :  { %253 = dma.done.wait [#allocation3], 256  }
  0x1b   :  { %254 = vsyncadd [#allocation3], 4294967040 }
  0x1c   :  { %255 = dma.done.wait [#allocation6], 256  }
  0x1d   :  { %256 = vsyncadd [#allocation6], 4294967040  ;;  %v265_v0 = vmov 0.0   ;;  %vm266_vm0 = vmmov 0   ;;  %v183_v1 = vld [vmem:[#allocation5 + $0x8] sm:$0xff]   ;;  %v184_v2 = vld [vmem:[#allocation5] sm:$0xff]  }
  0x1e   :  { %166 = vmatprep.subr.bf16.mxu0 %v265_v0  ;;  %170 = vmatprep.mubr.msk.bf16.mxu0 %vm266_vm0, %v265_v0  ;;  %v44_v3 = vld [vmem:[#allocation2] sm:$0xff]  ;;  %v45_v4 = vld [vmem:[#allocation2 + $0x8] sm:$0xff]  ;;  %vm70_vm1 = vcmask 261120  }
  0x1f   :  { %167 = vmatpush3.bf16.msra.mxu0 %v183_v1  ;;  %v46_v5 = vpack.c.bf16 %v45_v4, %v44_v3  ;;  %v159_v6 = vld [vmem:[%s308_s2] ss:$0 sm:$0xff]  ;;  %s267_s2 = smov [#allocation7]  }
  0x20   :  { %168 = vmatprep.subr.bf16.mxu0 %v265_v0  ;;  %s146_s26 = sshll.u32 %s267_s2, 4  ;;  %s147_s26 = int_to_ptr.vmem [resolvable:$true] %s146_s26 }
  0x21   :  { %s233_s27 = scalar_lea.vmem %s147_s26, 256  ;;  %p238_p11 = scmp.lt.s32.totalorder %s147_s26, %s147_s26 }
  0x22   :  { %p234_p10 = scmp.ne.s32.totalorder %s147_s26, %s233_s27  ;;  %p239_p12 = scmp.lt.s32.totalorder %s233_s27, %s233_s27 }
  0x23   :  { %169 = vmatpush3.bf16.msra.mxu0 %v184_v2 }
  0x24   :  { %p240_p13 = por %p239_p12, %p238_p11 }
  0x26   :  { %171 = vmatmul.mubr.msk.bf16.vlgmr.msra.gmra.mxu0 %vm70_vm1, %v46_v5  ;;  %p241_p0 = pnand %p240_p13, %p234_p10 }
  0xe6   :  { %v108_v7 = vpop.f32.mrf.mxu0 }
  0xe7   :  { %v109_v8 = vadd.f32 %v159_v6, %v108_v7 }
  0xe8   :  { %v172_v9 = vpop.f32.mrf.mxu0 }
  0xe9   :  { %115 = vmax.xlane.f32.xlu0 %v109_v8 }
  0xea   :  { %v111_v10 = vpop.f32.mrf.mxu0 }
  0xeb   :  { %v112_v11 = vadd.f32 %v159_v6, %v111_v10 }
  0xec   :  { %v173_v12 = vpop.f32.mrf.mxu0 }
  0xed   :  { %117 = vmax.xlane.f32.xlu0 %v112_v11 }
 0x172   :  { %v116_v13 = vpop.xlane.xlu0 %115 }
 0x173   :  { %v119_v14 = vsub.f32 %v109_v8, %v116_v13 }
 0x175   :  { %v121_v15 = vmul.f32 1.442695, %v119_v14 }
 0x176   :  { %v118_v16 = vpop.xlane.xlu0 %117 }
 0x177   :  { %185 = vpow2.f32 %v121_v15  ;;  %v120_v17 = vsub.f32 %v112_v11, %v118_v16 }
 0x179   :  { %v123_v18 = vmul.f32 1.442695, %v120_v17 }
 0x17b   :  { %187 = vpow2.f32 %v123_v18 }
 0x184   :  { %v186_v19 = vpop.eup %185 }
 0x185   :  { %125 = vadd.xlane.f32.xlu1 %v186_v19 }
 0x188   :  { %v188_v20 = vpop.eup %187 }
 0x189   :  { %127 = vadd.xlane.f32.xlu1 %v188_v20 }
 0x20e   :  { %v126_v21 = vpop.xlane.xlu1 %125 }
 0x20f   :  { %189 = vrcp.f32 %v126_v21 }
 0x212   :  { %v128_v22 = vpop.xlane.xlu1 %127 }
 0x213   :  { %191 = vrcp.f32 %v128_v22 }
 0x21c   :  { %v190_v23 = vpop.eup %189 }
 0x21d   :  { %v131_v24 = vmul.f32 %v190_v23, %v126_v21 }
 0x21f   :  { %v133_v25 = vsub.f32 2.0, %v131_v24 }
 0x220   :  { %v192_v26 = vpop.eup %191 }
 0x221   :  { %v135_v27 = vmul.f32 %v190_v23, %v133_v25  ;;  %v132_v28 = vmul.f32 %v192_v26, %v128_v22 }
 0x223   :  { %v134_v29 = vsub.f32 2.0, %v132_v28  ;;  %v137_v30 = vmul.f32 %v186_v19, %v135_v27 }
 0x225   :  { %v136_v31 = vmul.f32 %v192_v26, %v134_v29  ;;  %139 = vst [vmem:[#allocation7] sm:$0xff] %v137_v30 }
 0x227   :  { %v138_v32 = vmul.f32 %v188_v20, %v136_v31 }
 0x229   :  { %140 = vst [vmem:[#allocation7 + $0x8] sm:$0xff] %v138_v32 }
 0x22a   :  { %244 = shalt.err (!%p241_p0)
}
 0x22b   :  { %152 = dma.vmem_to_hbm [thread:$0]  %s147_s26, 256, %s309_s3, [#allocation4], %s260_s15, %s260_s15, %s261_s16  }
 0x22c   :  { %257 = dma.done.wait [#allocation4], 256  }
 0x22d   :  { %258 = vsyncadd [#allocation4], 4294967040 }
 0x22e   :  { %156 = vsyncpa [#allocation3], 1 }
 0x22f   :  { %157 = vsyncpa [#allocation6], 1 }
 0x230   :  { %158 = vsyncpa [#allocation4], 1 }

</bundles_post_ra>
